<compile_context>
chip_gen: v5e
topology: v5e:2x2
jax: 0.10.0
libtpu: 0.0.40
codegen_flags: <defaults>
</compile_context>

<pallas_src>
import math
from functools import partial

import jax
import jax.numpy as jnp
from jax import lax
from jax.experimental import pallas as pl
from jax.experimental.pallas import tpu as pltpu


def _maybe_cast(x, dtype):
    return x if dtype is None else x.astype(dtype)


def _default_vmem_limit_bytes():
    """Raise scoped VMEM above the small defaults, leaving physical headroom."""
    cap = 64 << 20  # conservative fallback (safe on every generation)
    try:
        info = pltpu.get_tpu_info()
        cap = int(getattr(info, "vmem_capacity_bytes", cap))
    except Exception:
        pass
    return max(32 << 20, min(cap - (16 << 20), 100 << 20))


# ----------------------------------------------------------------------------
# Stage 1: K / V projections (computed once; not per q-tile)
# ----------------------------------------------------------------------------
def _kv_proj_kernel(k_ref, v_ref, wk_ref, bk_ref, wv_ref, bv_ref,
                    kp_ref, vp_ref, *, mxu_dtype):
    k = _maybe_cast(k_ref[0], mxu_dtype)
    v = _maybe_cast(v_ref[0], mxu_dtype)
    wk = _maybe_cast(wk_ref[...], mxu_dtype)
    wv = _maybe_cast(wv_ref[...], mxu_dtype)
    kp = jnp.dot(k, wk, preferred_element_type=jnp.float32) + bk_ref[...]
    vp = jnp.dot(v, wv, preferred_element_type=jnp.float32) + bv_ref[...]
    kp_ref[0] = kp.astype(kp_ref.dtype)
    vp_ref[0] = vp.astype(vp_ref.dtype)


# ----------------------------------------------------------------------------
# Stage 2: fused q-projection + multi-head SDPA + output projection
# ----------------------------------------------------------------------------
def _attention_kernel(q_ref, kp_ref, vp_ref, wq_ref, bq_ref, wo_ref, bo_ref,
                      o_ref, slab_ref, *, num_heads, scale, mxu_dtype,
                      exp_dtype):
    """One (batch, q-tile) grid step.

    Shapes inside the kernel:
      q_ref: (1, TQ, E)   kp_ref/vp_ref: (1, Nk, C)
      wq: (E, C)  wo: (C, E)  biases: (1, dim)
      slab_ref (scratch): (TQ, C) f32      o_ref: (1, TQ, E)
    """
    q = _maybe_cast(q_ref[0], mxu_dtype)
    wq = _maybe_cast(wq_ref[...], mxu_dtype)
    # q projection: one K=E matmul.  Pre-scale by 1/sqrt(D): TQ*C muls instead
    # of scaling every (TQ, Nk) score tensor.
    qp = (jnp.dot(q, wq, preferred_element_type=jnp.float32)
          + bq_ref[...]) * scale                                     # (TQ, C)
    kp = kp_ref[0]                                                   # (Nk, C)
    vp = vp_ref[0]

    C = qp.shape[-1]
    D = C // num_heads

    # Heads: static Python loop (H <= 8 for SAM-style modules).  Each head's
    # (TQ, Nk) score/prob tensor is fully consumed by the slab store before
    # the next head begins, so only one head's intermediates stay live.
    # TODO(synk): switch to lax.fori_loop + pl.ds slicing for large H to
    # hard-bound live ranges.
    for h in range(num_heads):
        lo, hi = h * D, (h + 1) * D
        qh = _maybe_cast(qp[:, lo:hi], mxu_dtype)
        kh = _maybe_cast(kp[:, lo:hi], mxu_dtype)
        vh = _maybe_cast(vp[:, lo:hi], mxu_dtype)

        # q k^T contracting the last dim of both (no explicit transpose).
        s = lax.dot_general(qh, kh, (((1,), (1,)), ((), ())),
                            preferred_element_type=jnp.float32)      # (TQ, Nk)
        m = jnp.max(s, axis=-1, keepdims=True)
        p = jnp.exp(_maybe_cast(s - m, exp_dtype))
        denom = jnp.sum(p.astype(jnp.float32), axis=-1, keepdims=True)
        inv = pl.reciprocal(denom, approx=True)                      # EUP slot
        pv = jnp.dot(_maybe_cast(p, mxu_dtype), vh,
                     preferred_element_type=jnp.float32)             # (TQ, D)
        # Head merge == slab layout; just store into the head's column band.
        slab_ref[:, lo:hi] = pv * inv

    # Single K=C output projection (replaces H narrow K=D matmuls).
    attn = _maybe_cast(slab_ref[...], mxu_dtype)
    wo = _maybe_cast(wo_ref[...], mxu_dtype)
    out = jnp.dot(attn, wo, preferred_element_type=jnp.float32) + bo_ref[...]
    o_ref[0] = out.astype(o_ref.dtype)


# ----------------------------------------------------------------------------
# Wrapper
# ----------------------------------------------------------------------------
def attention_forward(params, cfg, q, k, v, *, block_q=256, block_k=1024,
                      use_bf16=False, vmem_limit_bytes=None):
    """q: (B, Nq, E), k/v: (B, Nk, E_kv)  ->  (B, Nq, E). Eval mode only."""
    assert cfg.get("dropout", 0.0) == 0.0, "dropout not implemented (eval only)"

    B, Nq, E = q.shape
    _, Nk, Ekv = k.shape
    H = cfg["num_heads"]
    C = cfg["internal_dim"]
    assert C % H == 0
    D = C // H

    wq, bq = params["q_proj"]
    wk, bk = params["k_proj"]
    wv, bv = params["v_proj"]
    wo, bo = params["out_proj"]

    # bf16 MXU operands / bf16 exp only when requested (changes numerics vs
    # the f32 reference; exp-in-bf16 only pays on v6e/v7x's bf16 VPU/EUP).
    mxu_dtype = jnp.bfloat16 if use_bf16 else None
    exp_dtype = jnp.bfloat16 if use_bf16 else None
    kv_dtype = jnp.bfloat16 if use_bf16 else q.dtype

    if vmem_limit_bytes is None:
        vmem_limit_bytes = _default_vmem_limit_bytes()
    cparams = pltpu.CompilerParams(
        dimension_semantics=("parallel", "parallel"),
        vmem_limit_bytes=vmem_limit_bytes)

    itemsize = q.dtype.itemsize
    kv_itemsize = jnp.dtype(kv_dtype).itemsize

    # ---------------- Stage 1: K/V projections --------------------------------
    tk = Nk if Nk <= block_k else block_k
    nk_blocks = pl.cdiv(Nk, tk)
    kv_flops = 2 * 2 * B * Nk * Ekv * C
    kv_bytes = ((k.size + v.size) * itemsize
                + (wk.size + wv.size + bk.size + bv.size) * itemsize
                + 2 * B * Nk * C * kv_itemsize)

    kp, vp = pl.pallas_call(
        partial(_kv_proj_kernel, mxu_dtype=mxu_dtype),
        out_shape=(jax.ShapeDtypeStruct((B, Nk, C), kv_dtype),
                   jax.ShapeDtypeStruct((B, Nk, C), kv_dtype)),
        grid=(B, nk_blocks),
        in_specs=[
            pl.BlockSpec((1, tk, Ekv), lambda b, i: (b, i, 0)),   # k tile
            pl.BlockSpec((1, tk, Ekv), lambda b, i: (b, i, 0)),   # v tile
            pl.BlockSpec((Ekv, C), lambda b, i: (0, 0)),          # wk (resident)
            pl.BlockSpec((1, C), lambda b, i: (0, 0)),            # bk
            pl.BlockSpec((Ekv, C), lambda b, i: (0, 0)),          # wv (resident)
            pl.BlockSpec((1, C), lambda b, i: (0, 0)),            # bv
        ],
        out_specs=(pl.BlockSpec((1, tk, C), lambda b, i: (b, i, 0)),
                   pl.BlockSpec((1, tk, C), lambda b, i: (b, i, 0))),
        compiler_params=cparams,
        cost_estimate=pl.CostEstimate(flops=kv_flops, transcendentals=0,
                                      bytes_accessed=kv_bytes),
    )(k, v, wk, bk.reshape(1, C), wv, bv.reshape(1, C))

    # ---------------- Stage 2: fused attention --------------------------------
    tq = Nq if Nq <= block_q else block_q
    nq_blocks = pl.cdiv(Nq, tq)
    scale = 1.0 / math.sqrt(D)

    attn_flops = 2 * B * (Nq * E * C + 2 * Nq * Nk * C + Nq * C * E)
    transcendentals = B * H * Nq * Nk
    attn_bytes = (q.size * itemsize
                  + 2 * B * Nk * C * kv_itemsize
                  + (wq.size + bq.size + wo.size + bo.size) * itemsize
                  + B * Nq * E * itemsize)

    kernel = partial(_attention_kernel, num_heads=H, scale=scale,
                     mxu_dtype=mxu_dtype, exp_dtype=exp_dtype)

    return pl.pallas_call(
        kernel,
        out_shape=jax.ShapeDtypeStruct((B, Nq, E), q.dtype),
        grid=(B, nq_blocks),
        in_specs=[
            pl.BlockSpec((1, tq, E), lambda b, i: (b, i, 0)),     # q tile
            pl.BlockSpec((1, Nk, C), lambda b, i: (b, 0, 0)),     # kp (resident per batch)
            pl.BlockSpec((1, Nk, C), lambda b, i: (b, 0, 0)),     # vp
            pl.BlockSpec((E, C), lambda b, i: (0, 0)),            # wq (resident)
            pl.BlockSpec((1, C), lambda b, i: (0, 0)),            # bq
            pl.BlockSpec((C, E), lambda b, i: (0, 0)),            # wo (resident)
            pl.BlockSpec((1, E), lambda b, i: (0, 0)),            # bo
        ],
        out_specs=pl.BlockSpec((1, tq, E), lambda b, i: (b, i, 0)),
        scratch_shapes=[pltpu.VMEM((tq, C), jnp.float32)],        # head slab
        compiler_params=cparams,
        cost_estimate=pl.CostEstimate(flops=attn_flops,
                                      transcendentals=transcendentals,
                                      bytes_accessed=attn_bytes),
    )(q, kp, vp, wq, bq.reshape(1, C), wo, bo.reshape(1, E))


# ----------------------------------------------------------------------------
# Parameters + pure-jnp reference
# ----------------------------------------------------------------------------
def init_attention_params(key, embedding_dim, num_heads, downsample_rate=1,
                          kv_in_dim=None, dtype=jnp.float32):
    kv_in_dim = kv_in_dim if kv_in_dim is not None else embedding_dim
    internal_dim = embedding_dim // downsample_rate
    assert internal_dim % num_heads == 0

    ks = jax.random.split(key, 8)

    def lin(kw, kb, fan_in, fan_out):
        bound = 1.0 / math.sqrt(fan_in)
        w = jax.random.uniform(kw, (fan_in, fan_out), dtype, -bound, bound)
        b = jax.random.uniform(kb, (fan_out,), dtype, -bound, bound)
        return w, b

    params = {
        "q_proj": lin(ks[0], ks[1], embedding_dim, internal_dim),
        "k_proj": lin(ks[2], ks[3], kv_in_dim, internal_dim),
        "v_proj": lin(ks[4], ks[5], kv_in_dim, internal_dim),
        "out_proj": lin(ks[6], ks[7], internal_dim, embedding_dim),
    }
    cfg = dict(embedding_dim=embedding_dim, internal_dim=internal_dim,
               num_heads=num_heads, dropout=0.0)
    return params, cfg


def _reference(params, cfg, q, k, v):
    B, Nq, _ = q.shape
    Nk = k.shape[1]
    H, C = cfg["num_heads"], cfg["internal_dim"]
    D = C // H
    qp = q @ params["q_proj"][0] + params["q_proj"][1]
    kp = k @ params["k_proj"][0] + params["k_proj"][1]
    vp = v @ params["v_proj"][0] + params["v_proj"][1]
    qh = qp.reshape(B, Nq, H, D).transpose(0, 2, 1, 3)
    kh = kp.reshape(B, Nk, H, D).transpose(0, 2, 1, 3)
    vh = vp.reshape(B, Nk, H, D).transpose(0, 2, 1, 3)
    s = jnp.einsum("bhqd,bhkd->bhqk", qh, kh) / math.sqrt(D)
    p = jax.nn.softmax(s, axis=-1)
    o = jnp.einsum("bhqk,bhkd->bhqd", p, vh)
    o = o.transpose(0, 2, 1, 3).reshape(B, Nq, C)
    return o @ params["out_proj"][0] + params["out_proj"][1]


if __name__ == "__main__":
    # Small shapes consistent with the module: cross attention where queries
    # and keys/values have different sequence lengths.
    B, Nq, Nk = 2, 8, 16
    embedding_dim, num_heads = 32, 4

    key = jax.random.PRNGKey(0)
    kq, kk, kv_, kp_ = jax.random.split(key, 4)
    q = jax.random.normal(kq, (B, Nq, embedding_dim), jnp.float32)
    k = jax.random.normal(kk, (B, Nk, embedding_dim), jnp.float32)
    v = jax.random.normal(kv_, (B, Nk, embedding_dim), jnp.float32)

    params, cfg = init_attention_params(kp_, embedding_dim, num_heads)
    ref = _reference(params, cfg, q, k, v)

    # f32 path (matches the PyTorch reference; softmax denominator uses the
    # EUP approximate reciprocal -> slightly loosened tolerance).
    out = attention_forward(params, cfg, q, k, v)
    out = jax.block_until_ready(out)
    assert out.shape == (B, Nq, embedding_dim)
    assert jnp.allclose(out, ref, atol=5e-3, rtol=5e-3), (
        float(jnp.max(jnp.abs(out - ref))))

    # bf16-MXU fast path (perf option for v6e/v7x) -- loose sanity check only.
    out_bf16 = attention_forward(params, cfg, q, k, v, use_bf16=True)
    out_bf16 = jax.block_until_ready(out_bf16)
    assert out_bf16.shape == (B, Nq, embedding_dim)
    assert bool(jnp.all(jnp.isfinite(out_bf16)))
    assert jnp.allclose(out_bf16, ref, atol=2e-1, rtol=2e-1), (
        float(jnp.max(jnp.abs(out_bf16 - ref))))

    print("KERNEL_OK")
</pallas_src>

<mosaic_0001>
module attributes {stable_mosaic.version = 11 : i64} {
  func.func @_kv_proj_kernel(%arg0: i32, %arg1: i32, %arg2: memref<1x16x32xf32, #tpu.memory_space<vmem>>, %arg3: memref<1x16x32xf32, #tpu.memory_space<vmem>>, %arg4: memref<32x32xf32, #tpu.memory_space<vmem>>, %arg5: memref<1x32xf32, #tpu.memory_space<vmem>>, %arg6: memref<32x32xf32, #tpu.memory_space<vmem>>, %arg7: memref<1x32xf32, #tpu.memory_space<vmem>>, %arg8: memref<1x16x32xf32, #tpu.memory_space<vmem>>, %arg9: memref<1x16x32xf32, #tpu.memory_space<vmem>>) attributes {dimension_semantics = [#tpu.dimension_semantics<parallel>, #tpu.dimension_semantics<parallel>], iteration_bounds = array<i64: 2, 1>, scalar_prefetch = 0 : i64, scratch_operands = 0 : i64, tpu.core_type = #tpu.core_type<tc>, window_params = [{transform_indices = @transform_0, window_bounds = array<i64: 1, 16, 32>}, {transform_indices = @transform_1, window_bounds = array<i64: 1, 16, 32>}, {pipeline_mode = #tpu.pipeline_mode<synchronous>, transform_indices = @transform_2, window_bounds = array<i64: 32, 32>}, {pipeline_mode = #tpu.pipeline_mode<synchronous>, transform_indices = @transform_3, window_bounds = array<i64: 1, 32>}, {pipeline_mode = #tpu.pipeline_mode<synchronous>, transform_indices = @transform_4, window_bounds = array<i64: 32, 32>}, {pipeline_mode = #tpu.pipeline_mode<synchronous>, transform_indices = @transform_5, window_bounds = array<i64: 1, 32>}, {transform_indices = @transform_6, window_bounds = array<i64: 1, 16, 32>}, {transform_indices = @transform_7, window_bounds = array<i64: 1, 16, 32>}]} {
    %c0 = arith.constant 0 : index
    %c0_0 = arith.constant 0 : index
    %c0_1 = arith.constant 0 : index
    %0 = vector.load %arg2[%c0, %c0_0, %c0_1] : memref<1x16x32xf32, #tpu.memory_space<vmem>>, vector<1x16x32xf32>
    %1 = vector.shape_cast %0 : vector<1x16x32xf32> to vector<16x32xf32>
    %c0_2 = arith.constant 0 : index
    %c0_3 = arith.constant 0 : index
    %c0_4 = arith.constant 0 : index
    %2 = vector.load %arg3[%c0_2, %c0_3, %c0_4] : memref<1x16x32xf32, #tpu.memory_space<vmem>>, vector<1x16x32xf32>
    %3 = vector.shape_cast %2 : vector<1x16x32xf32> to vector<16x32xf32>
    %c0_5 = arith.constant 0 : index
    %c0_6 = arith.constant 0 : index
    %4 = vector.load %arg4[%c0_5, %c0_6] : memref<32x32xf32, #tpu.memory_space<vmem>>, vector<32x32xf32>
    %c0_7 = arith.constant 0 : index
    %c0_8 = arith.constant 0 : index
    %5 = vector.load %arg6[%c0_7, %c0_8] : memref<32x32xf32, #tpu.memory_space<vmem>>, vector<32x32xf32>
    %cst = arith.constant dense<0.000000e+00> : vector<16x32xf32>
    %6 = tpu.matmul %1, %4, %cst {dimension_numbers = #tpu.dot_dimension_numbers<[1], [0], [0], [1], [0, 0, 1, 1], [], []>} : vector<16x32xf32>, vector<32x32xf32>, vector<16x32xf32> -> vector<16x32xf32>
    %c0_9 = arith.constant 0 : index
    %c0_10 = arith.constant 0 : index
    %7 = vector.load %arg5[%c0_9, %c0_10] : memref<1x32xf32, #tpu.memory_space<vmem>>, vector<1x32xf32>
    %8 = vector.broadcast %7 : vector<1x32xf32> to vector<16x32xf32>
    %9 = arith.addf %6, %8 : vector<16x32xf32>
    %cst_11 = arith.constant dense<0.000000e+00> : vector<16x32xf32>
    %10 = tpu.matmul %3, %5, %cst_11 {dimension_numbers = #tpu.dot_dimension_numbers<[1], [0], [0], [1], [0, 0, 1, 1], [], []>} : vector<16x32xf32>, vector<32x32xf32>, vector<16x32xf32> -> vector<16x32xf32>
    %c0_12 = arith.constant 0 : index
    %c0_13 = arith.constant 0 : index
    %11 = vector.load %arg7[%c0_12, %c0_13] : memref<1x32xf32, #tpu.memory_space<vmem>>, vector<1x32xf32>
    %12 = vector.broadcast %11 : vector<1x32xf32> to vector<16x32xf32>
    %13 = arith.addf %10, %12 : vector<16x32xf32>
    %c0_14 = arith.constant 0 : index
    %c0_15 = arith.constant 0 : index
    %c0_16 = arith.constant 0 : index
    %14 = vector.load %arg8[%c0_14, %c0_15, %c0_16] : memref<1x16x32xf32, #tpu.memory_space<vmem>>, vector<1x16x32xf32>
    %15 = vector.shape_cast %14 : vector<1x16x32xf32> to vector<16x32xf32>
    %16 = vector.shape_cast %9 : vector<16x32xf32> to vector<1x16x32xf32>
    tpu.vector_store %arg8[%c0_14, %c0_15, %c0_16], %16 {strides = array<i32>} : memref<1x16x32xf32, #tpu.memory_space<vmem>>, vector<1x16x32xf32>,
    %c0_17 = arith.constant 0 : index
    %c0_18 = arith.constant 0 : index
    %c0_19 = arith.constant 0 : index
    %17 = vector.load %arg9[%c0_17, %c0_18, %c0_19] : memref<1x16x32xf32, #tpu.memory_space<vmem>>, vector<1x16x32xf32>
    %18 = vector.shape_cast %17 : vector<1x16x32xf32> to vector<16x32xf32>
    %19 = vector.shape_cast %13 : vector<16x32xf32> to vector<1x16x32xf32>
    tpu.vector_store %arg9[%c0_17, %c0_18, %c0_19], %19 {strides = array<i32>} : memref<1x16x32xf32, #tpu.memory_space<vmem>>, vector<1x16x32xf32>,
    return
  }
  func.func @transform_0(%arg0: i32, %arg1: i32) -> (i32, i32, i32) {
    %c0_i32 = arith.constant 0 : i32
    %c0_i32_0 = arith.constant 0 : i32
    return %arg0, %arg1, %c0_i32 : i32, i32, i32
  }
  func.func @transform_1(%arg0: i32, %arg1: i32) -> (i32, i32, i32) {
    %c0_i32 = arith.constant 0 : i32
    %c0_i32_0 = arith.constant 0 : i32
    return %arg0, %arg1, %c0_i32 : i32, i32, i32
  }
  func.func @transform_2(%arg0: i32, %arg1: i32) -> (i32, i32) {
    %c0_i32 = arith.constant 0 : i32
    %c0_i32_0 = arith.constant 0 : i32
    %c0_i32_1 = arith.constant 0 : i32
    return %c0_i32, %c0_i32_0 : i32, i32
  }
  func.func @transform_3(%arg0: i32, %arg1: i32) -> (i32, i32) {
    %c0_i32 = arith.constant 0 : i32
    %c0_i32_0 = arith.constant 0 : i32
    %c0_i32_1 = arith.constant 0 : i32
    return %c0_i32, %c0_i32_0 : i32, i32
  }
  func.func @transform_4(%arg0: i32, %arg1: i32) -> (i32, i32) {
    %c0_i32 = arith.constant 0 : i32
    %c0_i32_0 = arith.constant 0 : i32
    %c0_i32_1 = arith.constant 0 : i32
    return %c0_i32, %c0_i32_0 : i32, i32
  }
  func.func @transform_5(%arg0: i32, %arg1: i32) -> (i32, i32) {
    %c0_i32 = arith.constant 0 : i32
    %c0_i32_0 = arith.constant 0 : i32
    %c0_i32_1 = arith.constant 0 : i32
    return %c0_i32, %c0_i32_0 : i32, i32
  }
  func.func @transform_6(%arg0: i32, %arg1: i32) -> (i32, i32, i32) {
    %c0_i32 = arith.constant 0 : i32
    %c0_i32_0 = arith.constant 0 : i32
    return %arg0, %arg1, %c0_i32 : i32, i32, i32
  }
  func.func @transform_7(%arg0: i32, %arg1: i32) -> (i32, i32, i32) {
    %c0_i32 = arith.constant 0 : i32
    %c0_i32_0 = arith.constant 0 : i32
    return %arg0, %arg1, %c0_i32 : i32, i32, i32
  }
}

</mosaic_0001>

<bundles_post_ra>
// kernel: tpu_custom_call.1
= control target key start
LH: loop header
LB: loop body
LE: loop exit
PB: predicated region body
PF: predicated region fallthrough
CT: control target
= control target key end

     0   :  { %s1369_s0 = inlined_call_operand.hbm [shape: f32[2,16,32], index: 0, kind: input, shape index: {}]   ;;  %s1370_s1 = inlined_call_operand.hbm [shape: f32[2,16,32], index: 1, kind: input, shape index: {}]   ;;  %s1371_s2 = inlined_call_operand.hbm [shape: f32[32,32], index: 2, kind: input, shape index: {}]   ;;  %s1372_s3 = inlined_call_operand.vmem [shape: f32[1,32], index: 3, kind: input, shape index: {}]   ;;  %s1373_s4 = inlined_call_operand.hbm [shape: f32[32,32], index: 4, kind: input, shape index: {}]   ;;  %s1374_s5 = inlined_call_operand.vmem [shape: f32[1,32], index: 5, kind: input, shape index: {}]   ;;  %s1375_s6 = inlined_call_operand.hbm [shape: f32[2,16,32], index: 6, kind: output, shape index: {0}]   ;;  %s1376_s7 = inlined_call_operand.hbm [shape: f32[2,16,32], index: 7, kind: output, shape index: {1}]  }
   0x1   :  { %1386 = sst [smem:[#allocation25_spill]] %s1371_s2 }
   0x2   :  { %1387 = sst [smem:[#allocation26_spill]] %s1373_s4 }
   0x3   :  { %13 = vsyncpa [#allocation3], 0 }
   0x4   :  { %15 = vsyncpa [#allocation3 + $0x1], 0 }
   0x5   :  { %16 = vsyncpa [#allocation6], 0 }
   0x6   :  { %18 = vsyncpa [#allocation6 + $0x1], 0 }
   0x7   :  { %19 = vsyncpa [#allocation9], 0 }
   0x8   :  { %20 = vsyncpa [#allocation4], 0 }
   0x9   :  { %22 = vsyncpa [#allocation4 + $0x1], 0 }
   0xa   :  { %23 = vsyncpa [#allocation12], 0 }
   0xb   :  { %25 = vsyncpa [#allocation12 + $0x1], 0  ;;  %s1142_s24 = smov 0   ;;  %s1144_s25 = smov 0  }
   0xc   :  { %s1146_s26 = smov 0   ;;  %s1148_s27 = smov 0  }
   0xd   :  { %s1150_s28 = smov 0   ;;  %s1152_s29 = smov 0  }
   0xe LB: > { %1388 = sst [smem:[#allocation19_spill]] %s1074_s24  ;;  %s1173_s30 = sadd.s32 4294967295, %s1094_s29   ;;  %s1094_s29 = sphi %s1152_s29, %s31_s29   ;;  %s1090_s28 = sphi %s1150_s28, %s1408_s28   ;;  %s1086_s27 = sphi %s1148_s27, %s1407_s27   ;;  %s1082_s26 = sphi %s1146_s26, %s1406_s26   ;;  %s1078_s25 = sphi %s1144_s25, %s1410_s25   ;;  %s1074_s24 = sphi %s1142_s24, %s1409_s24  }
   0xf   : > { %1389 = sst [smem:[#allocation20_spill]] %s1082_s26  ;;  %s707_s8 = sadd.s32 4294967294, %s1094_s29  }
  0x10   : > { %1390 = sst [smem:[#allocation21_spill]] %s1090_s28  ;;  %p65_p0 = scmp.ne.s32.totalorder %s1078_s25, %s1074_s24 }
  0x11   : > { %p66_p1 = scmp.eq.s32.totalorder %s1173_s30, 0  ;;  %p203_p2 = scmp.eq.s32.totalorder %s1173_s30, 1 }
  0x12   : > { %p209_p3 = scmp.eq.s32.totalorder %s707_s8, 1  ;;  %p708_p5 = scmp.ge.s32.totalorder %s1094_s29, 1 }
  0x13   : > { %p1182_p4 = por %p66_p1, %p65_p0  ;;  %p244_p7 = scmp.lt.s32.totalorder %s1094_s29, 3 }
  0x14   : > { %p1187_p6 = por %p209_p3, %p65_p0  ;;  %s1394_s2 = sld [smem:[#allocation25_spill]] }
  0x15   : > { %p1195_p8 = pnand %p708_p5, %p244_p7  ;;  %s1096_s15 = smov [#allocation7]  }
  0x16   : > { %s1392_s10 = scalar_select %p1187_p6, 1, 0 }
  0x17   : > { %p765_p9 = pneg %p1195_p8  ;;  %s257_s16 = sshll.u32 %s1096_s15, 4  ;;  %s258_s16 = int_to_ptr.vmem [resolvable:$true] %s257_s16 }
  0x18   : > { %1393 = sst [smem:[#allocation22_spill]] %s1392_s10  ;;  %p711_p11 = scmp.ge.s32.totalorder %s1094_s29, 2 }
  0x19   : > { %p766_p10 = pnand %p765_p9, %p66_p1  ;;  %s1396_s4 = sld [smem:[#allocation26_spill]] }
  0x1a   : > { %s255_s13 = sshll.u32 %s1394_s2, 4  ;;  %s1377_s20 = smov 128   ;;  %s256_s13 = int_to_ptr.hbm [resolvable:$true] %s255_s13 }
  0x1b   : > { %s1379_s21 = smov 8   ;;  %s1099_s22 = smov [#allocation8]  }
  0x1c   : > { %768 = dma.hbm_to_vmem [thread:$0]  (!%p766_p10), %s256_s13, 512, %s258_s16, [#allocation6], %s1377_s20, %s1377_s20, %s1379_s21  }
  0x1d   : > { %s274_s23 = sshll.u32 %s1099_s22, 4  ;;  %s43_s8 = sadd.s32 1, %s1090_s28  ;;  %s275_s23 = int_to_ptr.vmem [resolvable:$true] %s274_s23 }
  0x1e   : > { %s52_s11 = sadd.s32 1, %s1082_s26  ;;  %p45_p12 = scmp.ge.s32.totalorder %s43_s8, 2 }
  0x1f   : > { %s272_s19 = sshll.u32 %s1396_s4, 4  ;;  %p59_p13 = scmp.ne.s32.totalorder %s1082_s26, %s1078_s25  ;;  %s273_s19 = int_to_ptr.hbm [resolvable:$true] %s272_s19 }
  0x20   : > { %771 = dma.hbm_to_vmem [thread:$0]  (!%p766_p10), %s273_s19, 512, %s275_s23, [#allocation9], %s1377_s20, %s1377_s20, %s1379_s21  }
  0x21   : > { %p60_p0 = scmp.eq.s32.totalorder %s1094_s29, 0  ;;  %p788_p3 = scmp.lt.s32.totalorder %s1094_s29, 2 }
  0x22   : > { %s1412_s8 = smov (%p45_p12, %s43_s8), 0  ;;  %p1227_p7 = por %p203_p2, %p59_p13 }
  0x23   : > { %1397 = sst [smem:[#allocation23_spill]] %s1412_s8  ;;  %p1221_p5 = por %p60_p0, %p59_p13 }
  0x24   : > { %s47_s15 = ssub.s32 %s1090_s28, %s1412_s8  ;;  %s291_s16 = sand.u32 1, %s1082_s26  }
  0x25   : > { %p50_p9 = scmp.eq.s32.totalorder %s47_s15, 0  ;;  %s712_s17 = sshll.u32 %s291_s16, 4 }
  0x26   : > { %s737_s18 = sshll.u32 %s1090_s28, 4  ;;  %s295_s2 = scalar_lea.vmem [#allocation2], %s712_s17 }
  0x27   : > { %s1236_s19 = scalar_select %p50_p9, %s1082_s26, %s52_s11  }
  0x28   : > { %s302_s20 = scalar_lea.hbm %s1369_s0, %s737_s18  ;;  %s305_s4 = sshll.u32 %s295_s2, 4  ;;  %s306_s4 = int_to_ptr.vmem [resolvable:$true] %s305_s4 }
  0x29   : > { %1400 = sst [smem:[#allocation24_spill]] %s1236_s19  ;;  %s303_s21 = sshll.u32 %s302_s20, 4  ;;  %s304_s21 = int_to_ptr.hbm [resolvable:$true] %s303_s21 }
  0x2a   : > { %p773_p2 = pnand %p788_p3, %p1221_p5  ;;  %s326_s15 = scalar_lea.hbm %s1370_s1, %s737_s18 }
  0x2b   : > { %s319_s28 = scalar_lea.vmem [#allocation5], %s712_s17  ;;  %s327_s19 = sshll.u32 %s326_s15, 4  ;;  %s328_s19 = int_to_ptr.hbm [resolvable:$true] %s327_s19 }
  0x2c   : > { %s329_s11 = sshll.u32 %s319_s28, 4  ;;  %s292_s26 = scalar_lea.sflag [#allocation3], %s291_s16  ;;  %s330_s11 = int_to_ptr.vmem [resolvable:$true] %s329_s11 }
  0x2d   : > { %s1401_s24 = smov 8   ;;  %s1402_s22 = smov 128  }
  0x2e   : > { %775 = dma.hbm_to_vmem [thread:$0]  (!%p773_p2), %s304_s21, 256, %s306_s4, %s292_s26, %s1402_s22, %s1402_s22, %s1401_s24  }
  0x2f   : > { %s315_s2 = sand.u32 1, %s1094_s29   ;;  %341 = sbr.rel (%p1195_p8) target bundleno = 219 (0xdb), region = 44 }
  0x30   : > { %s316_s20 = scalar_lea.sflag [#allocation6], %s315_s2  ;;  %s1258_s28 = sand.u32 (!%p1195_p8), 1, %s1078_s25  }
  0x31   : > { %778 = dma.hbm_to_vmem [thread:$0]  (!%p773_p2), %s328_s19, 256, %s330_s11, %s316_s20, %s1402_s22, %s1402_s22, %s1401_s24  }
  0x32   : > { %s1261_s10 = sshll.u32 (!%p1195_p8), %s1258_s28, 4  ;;  %s344_s4 = scalar_lea.sflag (!%p1195_p8), [#allocation3], %s1258_s28 }
  0x33   : > { %s347_s26 = scalar_lea.vmem (!%p1195_p8), [#allocation2], %s1261_s10 }
  0x34   : > { %1049 = dma.done.wait (%p1182_p4), %s344_s4, 256  }
  0x35   : > { %1051 = vsyncadd (%p1182_p4), %s344_s4, 4294967040  ;;  %s353_s24 = sand.u32 1, %s1173_s30   ;;  %s357_s21 = scalar_lea.vmem [#allocation5], %s1261_s10 }
  0x36   : > { %s354_s14 = scalar_lea.sflag [#allocation6], %s353_s24 }
  0x37   : > { %1053 = dma.done.wait (%p1182_p4), %s354_s14, 256  }
  0x38   : > { %1055 = vsyncadd (%p1182_p4), %s354_s14, 4294967040 }
  0x39   : > { %1057 = dma.done.wait (%p66_p1), [#allocation6], 512  }
  0x3a   : > { %1059 = vsyncadd (%p66_p1), [#allocation6], 4294966784 }
  0x3b   : > { %1061 = dma.done.wait (%p66_p1), [#allocation9], 512  }
  0x3c   : > { %1063 = vsyncadd (%p66_p1), [#allocation9], 4294966784  ;;  %v420_v0 = vld [vmem:[#allocation7 + $0x18] sm:$0xff]  ;;  %v419_v2 = vld [vmem:[#allocation7 + $0x10] sm:$0xff]  ;;  %vm429_vm0 = vcmask 261120   ;;  %s739_s30 = sshll.u32 %s1086_s27, 4 }
  0x3d   : > { %v424_v1 = vld [vmem:[#allocation8 + $0x18] sm:$0xff]  ;;  %741 = vmatpush.msra.mxu2 %v420_v0  ;;  %v423_v3 = vld [vmem:[#allocation8 + $0x10] sm:$0xff]  ;;  %v418_v4 = vld [vmem:[#allocation7 + $0x8] sm:$0xff]  ;;  %448 = vmatpush.msra.mxu0 %v420_v0  ;;  %s515_s19 = scalar_lea.hbm %s1375_s6, %s739_s30  ;;  %s401_s23 = scalar_lea.vmem [#allocation10], %s1261_s10 }
  0x3e   : > { %745 = vmatpush.msra.mxu3 %v424_v1  ;;  %v422_v5 = vld [vmem:[#allocation8 + $0x8] sm:$0xff]  ;;  %481 = vmatpush.msra.mxu1 %v424_v1  ;;  %v417_v6 = vld [vmem:[#allocation7] sm:$0xff]  ;;  %s516_s15 = sshll.u32 %s401_s23, 4  ;;  %s408_s11 = scalar_lea.vmem [#allocation11], %s1261_s10  ;;  %s1311_s15 = int_to_ptr.vmem [resolvable:$true] %s516_s15 }
  0x3f   : > { %742 = vmatpush.msra.mxu2 %v419_v2  ;;  %v421_v7 = vld [vmem:[#allocation8] sm:$0xff]  ;;  %449 = vmatpush.msra.mxu0 %v419_v2  ;;  %v414_v8 = vld [vmem:[%s347_s26 + $0x8] sm:$0xff]  ;;  %s535_s27 = sshll.u32 %s408_s11, 4  ;;  %s534_s20 = scalar_lea.hbm %s1376_s7, %s739_s30  ;;  %s1314_s27 = int_to_ptr.vmem [resolvable:$true] %s535_s27 }
  0x40   : > { %746 = vmatpush.msra.mxu3 %v423_v3  ;;  %482 = vmatpush.msra.mxu1 %v423_v3  ;;  %v416_v9 = vld [vmem:[%s357_s21 + $0x8] sm:$0xff]  ;;  %v413_v10 = vld [vmem:[%s347_s26] sm:$0xff]  ;;  %s518_s4 = sshll.u32 %s515_s19, 4  ;;  %s537_s26 = sshll.u32 %s534_s20, 4  ;;  %s519_s4 = int_to_ptr.hbm [resolvable:$true] %s518_s4  ;;  %s1317_s26 = int_to_ptr.hbm [resolvable:$true] %s537_s26 }
  0x41   : > { %743 = vmatpush.msra.mxu2 %v418_v4  ;;  %450 = vmatpush.msra.mxu0 %v418_v4  ;;  %v415_v11 = vld [vmem:[%s357_s21] sm:$0xff]  ;;  %s497_s10 = scalar_lea.sflag [#allocation4], %s1258_s28  ;;  %s982_s24 = sshra.s32 %s519_s4, 4  ;;  %s983_s24 = int_to_ptr.hbm [resolvable:$true] %s982_s24 }
  0x42   : > { %747 = vmatpush.msra.mxu3 %v422_v5  ;;  %483 = vmatpush.msra.mxu1 %v422_v5  ;;  %v846_v12 = vld [vmem:[%s1372_s3] ss:$0 sm:$0xff]  ;;  %s984_s14 = scalar_lea.hbm %s983_s24, 16  ;;  %s988_s9 = scalar_lea.hbm %s1375_s6, 32 }
  0x43   : > { %744 = vmatpush.msra.mxu2 %v417_v6  ;;  %451 = vmatpush.msra.mxu0 %v417_v6  ;;  %v847_v13 = vld [vmem:[%s1374_s5] ss:$0 sm:$0xff]  ;;  %p985_p1 = scmp.ne.s32.totalorder %s983_s24, %s984_s14  ;;  %p989_p10 = scmp.lt.s32.totalorder %s983_s24, %s1375_s6 }
  0x44   : > { %748 = vmatpush.msra.mxu3 %v421_v7  ;;  %726 = vmatmul.msk.f32.vlgmr.msra.gmra.mxu2 %vm429_vm0, %v414_v8  ;;  %p990_p12 = scmp.lt.s32.totalorder %s988_s9, %s984_s14 }
  0x45   : > { %728 = vmatmul.msk.f32.vlgmr.msra.gmra.mxu3 %vm429_vm0, %v416_v9  ;;  %484 = vmatpush.msra.mxu1 %v421_v7  ;;  %p986_p4 = pnand %p985_p1, %p1227_p7 }
  0x46   : > { %725 = vmatmul.msk.f32.vlgmr.msra.gmra.mxu0 %vm429_vm0, %v413_v10  ;;  %727 = vmatmul.msk.f32.vlgmr.msra.gmra.mxu1 %vm429_vm0, %v415_v11  ;;  %p991_p13 = por %p990_p12, %p989_p10 }
  0x47   : > { %p987_p8 = pneg %p986_p4 }
  0x49   : > { %p992_p0 = pnand %p991_p13, %p987_p8 }
  0xc3   : > { %v453_v14 = vpop.f32.mrf.mxu0  ;;  %v486_v15 = vpop.f32.mrf.mxu1 }
  0xc4   : > { %v454_v16 = vadd.f32 %v846_v12, %v453_v14  ;;  %v487_v17 = vadd.f32 %v847_v13, %v486_v15 }
  0xc6   : > { %492 = vst.msk [vmem:[%s401_s23] sm:$0xff] %vm429_vm0, %v454_v16 }
  0xc7   : > { %v456_v18 = vpop.f32.mrf.mxu2  ;;  %494 = vst.msk [vmem:[%s408_s11] sm:$0xff] %vm429_vm0, %v487_v17 }
  0xc8   : > { %v489_v19 = vpop.f32.mrf.mxu3  ;;  %v457_v20 = vadd.f32 %v846_v12, %v456_v18 }
  0xc9   : > { %v490_v21 = vadd.f32 %v847_v13, %v489_v19 }
  0xca   : > { %493 = vst.msk [vmem:[%s401_s23 + $0x8] sm:$0xff] %vm429_vm0, %v457_v20 }
  0xcb   : > { %495 = vst.msk [vmem:[%s408_s11 + $0x8] sm:$0xff] %vm429_vm0, %v490_v21 }
  0xcc   : > { %995 = shalt.err (!%p992_p0)
}
  0xcd   : > { %s1100_s16 = smov 128   ;;  %s1101_s17 = smov 8  }
  0xce   : > { %761 = dma.vmem_to_hbm [thread:$0]  (%p1227_p7), %s1311_s15, 256, %s519_s4, %s497_s10, %s1100_s16, %s1100_s16, %s1101_s17  }
  0xcf   : > { %s502_s18 = scalar_lea.sflag [#allocation12], %s1258_s28  ;;  %s1010_s19 = sshra.s32 %s1317_s26, 4  ;;  %s1011_s19 = int_to_ptr.hbm [resolvable:$true] %s1010_s19 }
  0xd0   : > { %s1012_s23 = scalar_lea.hbm %s1011_s19, 16  ;;  %s1016_s2 = scalar_lea.hbm %s1376_s7, 32 }
  0xd1   : > { %p1013_p3 = scmp.ne.s32.totalorder %s1011_s19, %s1012_s23  ;;  %p1017_p2 = scmp.lt.s32.totalorder %s1011_s19, %s1376_s7 }
  0xd2   : > { %p1018_p1 = scmp.lt.s32.totalorder %s1016_s2, %s1012_s23 }
  0xd3   : > { %p1014_p5 = pnand %p1013_p3, %p1227_p7 }
  0xd4   : > { %p1019_p4 = por %p1018_p1, %p1017_p2 }
  0xd5   : > { %p1015_p9 = pneg %p1014_p5 }
  0xd7   : > { %p1020_p8 = pnand %p1019_p4, %p1015_p9 }
  0xd9   : > { %1023 = shalt.err (!%p1020_p8)
}
  0xda   : > { %762 = dma.vmem_to_hbm [thread:$0]  (%p1227_p7), %s1314_s27, 256, %s1317_s26, %s502_s18, %s1100_s16, %s1100_s16, %s1101_s17  }
  0xdb PF: > { %s1403_s28 = sld [smem:[#allocation19_spill]]  ;;  %p780_p10 = pnand %p711_p11, %p1187_p6 }
  0xdd   : > { %p781_p12 = pneg %p780_p10 }
  0xe1   : > { %s552_s4 = sand.u32 1, %s1403_s28  }
  0xe2   : > { %s553_s10 = scalar_lea.sflag [#allocation4], %s552_s4 }
  0xe3   : > { %1065 = dma.done.wait (%p781_p12), %s553_s10, 256  }
  0xe4   : > { %1067 = vsyncadd (%p781_p12), %s553_s10, 4294967040  ;;  %s563_s14 = scalar_lea.sflag [#allocation12], %s552_s4 }
  0xe5   : > { %1069 = dma.done.wait (%p781_p12), %s563_s14, 256  }
  0xe6   : > { %1071 = vsyncadd (%p781_p12), %s563_s14, 4294967040  ;;  %s31_s29 = sadd.s32 1, %s1094_s29   ;;  %s1405_s13 = sld [smem:[#allocation20_spill]] }
  0xe7   : > { %p28_p13 = scmp.ge.s32.totalorder %s31_s29, 4   ;;  %s1406_s26 = sld [smem:[#allocation24_spill]] }
  0xe8   : > { %s1407_s27 = sld [smem:[#allocation21_spill]]  ;;  %s1409_s24 = smov %s1078_s25 }
  0xe9   : > { %s1408_s28 = sld [smem:[#allocation23_spill]]  ;;  %30 = sbr.rel (!%p28_p13) target bundleno = 14 (0xe), region = 127 }
  0xec   : > { %s1410_s25 = smov %s1405_s13 }
  0xee   :  { %569 = vsyncpa [#allocation3], 1 }
  0xef   :  { %571 = vsyncpa [#allocation3 + $0x1], 1 }
  0xf0   :  { %572 = vsyncpa [#allocation6], 1 }
  0xf1   :  { %574 = vsyncpa [#allocation6 + $0x1], 1 }
  0xf2   :  { %575 = vsyncpa [#allocation9], 1 }
  0xf3   :  { %576 = vsyncpa [#allocation4], 1 }
  0xf4   :  { %578 = vsyncpa [#allocation4 + $0x1], 1 }
  0xf5   :  { %579 = vsyncpa [#allocation12], 1 }
  0xf6   :  { %581 = vsyncpa [#allocation12 + $0x1], 1 }

</bundles_post_ra>
